<compile_context>
chip_gen: v7x
topology: tpu7x:2x2x1
jax: 0.10.0
libtpu: 0.0.40
codegen_flags: <defaults>
</compile_context>

<pallas_src>
import jax
import jax.numpy as jnp
from jax.experimental import pallas as pl
from jax.experimental.pallas import tpu as pltpu


def mlp_kernel(x_ref, w1_ref, b1_ref, w2_ref, b2_ref, o_ref):
    # Two MXU matmuls with f32 accumulation + f32 epilogue (bias, ReLU).
    x = x_ref[...]                                            # (TB, in)
    h = jnp.dot(x, w1_ref[...],
                preferred_element_type=jnp.float32)           # (TB, hid) f32
    h = jnp.maximum(h + b1_ref[...], 0.0)                     # bias + ReLU in f32
    # Cast activations to the weight dtype for the second MXU pass (no-op for f32).
    o = jnp.dot(h.astype(w2_ref.dtype), w2_ref[...],
                preferred_element_type=jnp.float32)           # (TB, out) f32
    o_ref[...] = (o + b2_ref[...]).astype(o_ref.dtype)


def _round_up(a, m):
    return -(-a // m) * m


def simple_nn_forward(x, w1, b1, w2, b2, *, block_batch=1024, compute_dtype=None):
    """x: (B, in) ; w1: (in, hid); b1: (hid,); w2: (hid, out); b2: (out,).

    compute_dtype: optionally cast x/w1/w2 (e.g. jnp.bfloat16) for the matmuls;
    accumulation, bias add and ReLU stay in f32. Output keeps x's original dtype.
    """
    orig_batch, in_size = x.shape
    hidden_size = w1.shape[1]
    out_size = w2.shape[1]
    out_dtype = x.dtype

    if compute_dtype is not None:
        x = x.astype(compute_dtype)
        w1 = w1.astype(compute_dtype)
        w2 = w2.astype(compute_dtype)
    b1_2d = b1.astype(jnp.float32).reshape(1, hidden_size)
    b2_2d = b2.astype(jnp.float32).reshape(1, out_size)

    # Sublane alignment: 8 rows for 32-bit x, 16 rows for sub-32-bit operands
    # so packed (bf16) row pairs never straddle a batch tile.
    sub = 16 if jnp.dtype(x.dtype).itemsize < 4 else 8

    # Batch tile: as large as requested, but (a) no larger than the rounded-up
    # batch and (b) split into >= 2 grid steps when the batch allows it so the
    # "parallel" grid axis can shard across both TensorCores on v7x.  VMEM
    # footprint (~2 * tb * (in + out) * 4 B + <15 KB weights) is tiny either way.
    tb = min(max(sub, (block_batch // sub) * sub), _round_up(orig_batch, sub))
    if orig_batch >= 2 * sub and _round_up(orig_batch, tb) // tb < 2:
        tb = max(sub, ((_round_up(orig_batch, 2 * sub) // 2) // sub) * sub)

    padded_batch = _round_up(orig_batch, tb)
    if padded_batch != orig_batch:
        x = jnp.pad(x, ((0, padded_batch - orig_batch), (0, 0)))
    grid = (padded_batch // tb,)

    out = pl.pallas_call(
        mlp_kernel,
        out_shape=jax.ShapeDtypeStruct((padded_batch, out_size), out_dtype),
        grid_spec=pltpu.PrefetchScalarGridSpec(
            num_scalar_prefetch=0,
            grid=grid,
            in_specs=[
                # x streams per batch tile (double-buffered by the pipeline).
                pl.BlockSpec((tb, in_size), lambda i: (i, 0)),
                # Weights / biases: full blocks, same index every step ->
                # loaded once, VMEM-resident.
                pl.BlockSpec(w1.shape, lambda i: (0, 0)),
                pl.BlockSpec(b1_2d.shape, lambda i: (0, 0)),
                pl.BlockSpec(w2.shape, lambda i: (0, 0)),
                pl.BlockSpec(b2_2d.shape, lambda i: (0, 0)),
            ],
            # Narrow, un-padded output block: out_size equals the full array
            # dim, tb is sublane-aligned; each block is contiguous in HBM.
            out_specs=pl.BlockSpec((tb, out_size), lambda i: (i, 0)),
        ),
        compiler_params=pltpu.CompilerParams(
            dimension_semantics=("parallel",)),  # megacore sharding on v7x
    )(x, w1, b1_2d, w2, b2_2d)

    # Only slice away batch-padding rows (tiny axis); no column slice needed.
    if padded_batch != orig_batch:
        out = out[:orig_batch]
    return out


def init_params(key, input_size=10, hidden_size=20, output_size=2):
    """Deterministic PyTorch-style (Kaiming-uniform-ish) init for nn.Linear."""
    k1, k2, k3, k4 = jax.random.split(key, 4)
    bound1 = 1.0 / jnp.sqrt(input_size)
    bound2 = 1.0 / jnp.sqrt(hidden_size)
    # Stored already transposed to (in, out) for the kernel.
    w1 = jax.random.uniform(k1, (input_size, hidden_size), jnp.float32,
                            -bound1, bound1)
    b1 = jax.random.uniform(k2, (hidden_size,), jnp.float32, -bound1, bound1)
    w2 = jax.random.uniform(k3, (hidden_size, output_size), jnp.float32,
                            -bound2, bound2)
    b2 = jax.random.uniform(k4, (output_size,), jnp.float32, -bound2, bound2)
    return w1, b1, w2, b2


if __name__ == "__main__":
    key = jax.random.PRNGKey(0)
    key_x, key_p, key_x2 = jax.random.split(key, 3)

    batch, input_size, hidden_size, output_size = 4, 10, 20, 2
    x = jax.random.normal(key_x, (batch, input_size), jnp.float32)
    w1, b1, w2, b2 = init_params(key_p, input_size, hidden_size, output_size)
    ref_fn = lambda a: jnp.maximum(a @ w1 + b1, 0.0) @ w2 + b2

    # --- f32 path at the module's native tiny shapes (exact semantics check).
    out = simple_nn_forward(x, w1, b1, w2, b2)
    out = jax.block_until_ready(out)
    assert out.shape == (batch, output_size)
    assert jnp.allclose(out, ref_fn(x), atol=1e-5, rtol=1e-5)

    # --- Larger, non-tile-multiple batch in f32: exercises the "split into
    # >= 2 grid steps" path (tb=152, grid=(2,)) used for v7x megacore.
    big_batch = 300
    xb = jax.random.normal(key_x2, (big_batch, input_size), jnp.float32)
    out_big = jax.block_until_ready(simple_nn_forward(xb, w1, b1, w2, b2))
    assert out_big.shape == (big_batch, output_size)
    assert jnp.allclose(out_big, ref_fn(xb), atol=1e-5, rtol=1e-5)

    # --- bf16 operands with f32 accumulation, multi-step grid (16-row-aligned
    # tiles), output kept f32.
    out_bf = simple_nn_forward(xb, w1, b1, w2, b2,
                               block_batch=128, compute_dtype=jnp.bfloat16)
    out_bf = jax.block_until_ready(out_bf)

    hb = jnp.maximum(
        jnp.dot(xb.astype(jnp.bfloat16), w1.astype(jnp.bfloat16),
                preferred_element_type=jnp.float32) + b1, 0.0)
    ref_bf = jnp.dot(hb.astype(jnp.bfloat16), w2.astype(jnp.bfloat16),
                     preferred_element_type=jnp.float32) + b2
    assert out_bf.shape == (big_batch, output_size)
    assert jnp.allclose(out_bf, ref_bf.astype(out_bf.dtype), atol=2e-2, rtol=2e-2)

    print("KERNEL_OK")
</pallas_src>

<mosaic_0001>
module attributes {stable_mosaic.version = 11 : i64} {
  func.func @mlp_kernel(%arg0: i32, %arg1: memref<8x10xf32, #tpu.memory_space<vmem>>, %arg2: memref<10x20xf32, #tpu.memory_space<vmem>>, %arg3: memref<1x20xf32, #tpu.memory_space<vmem>>, %arg4: memref<20x2xf32, #tpu.memory_space<vmem>>, %arg5: memref<1x2xf32, #tpu.memory_space<vmem>>, %arg6: memref<8x2xf32, #tpu.memory_space<vmem>>) attributes {dimension_semantics = [#tpu.dimension_semantics<parallel>], iteration_bounds = array<i64: 1>, scalar_prefetch = 0 : i64, scratch_operands = 0 : i64, tpu.core_type = #tpu.core_type<tc>, window_params = [{transform_indices = @transform_0, window_bounds = array<i64: 8, 10>}, {pipeline_mode = #tpu.pipeline_mode<synchronous>, transform_indices = @transform_1, window_bounds = array<i64: 10, 20>}, {pipeline_mode = #tpu.pipeline_mode<synchronous>, transform_indices = @transform_2, window_bounds = array<i64: 1, 20>}, {pipeline_mode = #tpu.pipeline_mode<synchronous>, transform_indices = @transform_3, window_bounds = array<i64: 20, 2>}, {pipeline_mode = #tpu.pipeline_mode<synchronous>, transform_indices = @transform_4, window_bounds = array<i64: 1, 2>}, {transform_indices = @transform_5, window_bounds = array<i64: 8, 2>}]} {
    %c0 = arith.constant 0 : index
    %c0_0 = arith.constant 0 : index
    %0 = vector.load %arg1[%c0, %c0_0] : memref<8x10xf32, #tpu.memory_space<vmem>>, vector<8x10xf32>
    %c0_1 = arith.constant 0 : index
    %c0_2 = arith.constant 0 : index
    %1 = vector.load %arg2[%c0_1, %c0_2] : memref<10x20xf32, #tpu.memory_space<vmem>>, vector<10x20xf32>
    %cst = arith.constant dense<0.000000e+00> : vector<8x20xf32>
    %2 = tpu.matmul %0, %1, %cst {dimension_numbers = #tpu.dot_dimension_numbers<[1], [0], [0], [1], [0, 0, 1, 1], [], []>} : vector<8x10xf32>, vector<10x20xf32>, vector<8x20xf32> -> vector<8x20xf32>
    %c0_3 = arith.constant 0 : index
    %c0_4 = arith.constant 0 : index
    %3 = vector.load %arg3[%c0_3, %c0_4] : memref<1x20xf32, #tpu.memory_space<vmem>>, vector<1x20xf32>
    %4 = vector.broadcast %3 : vector<1x20xf32> to vector<8x20xf32>
    %5 = arith.addf %2, %4 : vector<8x20xf32>
    %cst_5 = arith.constant 0.000000e+00 : f32
    %6 = vector.broadcast %cst_5 : f32 to vector<8x20xf32>
    %7 = arith.maximumf %5, %6 : vector<8x20xf32>
    %c0_6 = arith.constant 0 : index
    %c0_7 = arith.constant 0 : index
    %8 = vector.load %arg4[%c0_6, %c0_7] : memref<20x2xf32, #tpu.memory_space<vmem>>, vector<20x2xf32>
    %cst_8 = arith.constant dense<0.000000e+00> : vector<8x2xf32>
    %9 = tpu.matmul %7, %8, %cst_8 {dimension_numbers = #tpu.dot_dimension_numbers<[1], [0], [0], [1], [0, 0, 1, 1], [], []>} : vector<8x20xf32>, vector<20x2xf32>, vector<8x2xf32> -> vector<8x2xf32>
    %c0_9 = arith.constant 0 : index
    %c0_10 = arith.constant 0 : index
    %10 = vector.load %arg5[%c0_9, %c0_10] : memref<1x2xf32, #tpu.memory_space<vmem>>, vector<1x2xf32>
    %11 = vector.broadcast %10 : vector<1x2xf32> to vector<8x2xf32>
    %12 = arith.addf %9, %11 : vector<8x2xf32>
    %c0_11 = arith.constant 0 : index
    %c0_12 = arith.constant 0 : index
    %13 = vector.load %arg6[%c0_11, %c0_12] : memref<8x2xf32, #tpu.memory_space<vmem>>, vector<8x2xf32>
    tpu.vector_store %arg6[%c0_11, %c0_12], %12 {strides = array<i32>} : memref<8x2xf32, #tpu.memory_space<vmem>>, vector<8x2xf32>,
    return
  }
  func.func @transform_0(%arg0: i32) -> (i32, i32) {
    %c0_i32 = arith.constant 0 : i32
    %c0_i32_0 = arith.constant 0 : i32
    return %arg0, %c0_i32 : i32, i32
  }
  func.func @transform_1(%arg0: i32) -> (i32, i32) {
    %c0_i32 = arith.constant 0 : i32
    %c0_i32_0 = arith.constant 0 : i32
    %c0_i32_1 = arith.constant 0 : i32
    return %c0_i32, %c0_i32_0 : i32, i32
  }
  func.func @transform_2(%arg0: i32) -> (i32, i32) {
    %c0_i32 = arith.constant 0 : i32
    %c0_i32_0 = arith.constant 0 : i32
    %c0_i32_1 = arith.constant 0 : i32
    return %c0_i32, %c0_i32_0 : i32, i32
  }
  func.func @transform_3(%arg0: i32) -> (i32, i32) {
    %c0_i32 = arith.constant 0 : i32
    %c0_i32_0 = arith.constant 0 : i32
    %c0_i32_1 = arith.constant 0 : i32
    return %c0_i32, %c0_i32_0 : i32, i32
  }
  func.func @transform_4(%arg0: i32) -> (i32, i32) {
    %c0_i32 = arith.constant 0 : i32
    %c0_i32_0 = arith.constant 0 : i32
    %c0_i32_1 = arith.constant 0 : i32
    return %c0_i32, %c0_i32_0 : i32, i32
  }
  func.func @transform_5(%arg0: i32) -> (i32, i32) {
    %c0_i32 = arith.constant 0 : i32
    %c0_i32_0 = arith.constant 0 : i32
    return %arg0, %c0_i32 : i32, i32
  }
}

</mosaic_0001>

<bundles_post_ra>
// kernel: tpu_custom_call.1
= control target key start
LH: loop header
LB: loop body
LE: loop exit
PB: predicated region body
PF: predicated region fallthrough
CT: control target
= control target key end

     0   :  { %vm34_vm0 = vcmask 1041408   ;;  %v243_v0 = vmov 0.0|0.0   ;;  %vm244_vm1 = vmmov 1   ;;  %vm245_vm3 = vmmov 0   ;;  %s304_s1 = inlined_call_operand.vmem [shape: f32[10,20], index: 1, kind: input, shape index: {}]   ;;  %s305_s0 = inlined_call_operand.vmem [shape: f32[8,10], index: 0, kind: input, shape index: {}]   ;;  %s306_s3 = inlined_call_operand.vmem [shape: f32[20,2], index: 3, kind: input, shape index: {}]   ;;  %s307_s2 = inlined_call_operand.vmem [shape: f32[1,20], index: 2, kind: input, shape index: {}]   ;;  %s308_s4 = inlined_call_operand.vmem [shape: f32[1,2], index: 4, kind: input, shape index: {}]   ;;  %s309_s5 = inlined_call_operand.vmem [shape: f32[8,2], index: 5, kind: output, shape index: {}]  }
   0x1   :  { %232 = vmatprep.subr.bf16.mxu0 %v243_v0  ;;  %v21_v1 = vld [vmem:[%s304_s1] sm:$0xff]  ;;  %v22_v2 = vld [vmem:[%s304_s1 + $0x8] sm:$0x3]  ;;  %vm234_vm2 = vmpackc.low %vm34_vm0, %vm244_vm1  ;;  %236 = vmatprep.subr.bf16.mxu1 %v243_v0  ;;  %v246_v4 = vmov 0.0   ;;  %vm30_vm4 = vcmask 80896   ;;  %vm123_vm5 = vcmask 1043456  }
   0x2   :  { %v233_v3 = vpack.c.bf16 %v22_v2, %v21_v1  ;;  %220 = vmatprep.mubr.msk.f32.mxu0 %vm245_vm3, %v246_v4  ;;  %229 = vmatprep.mubr.msk.f32.mxu1 %vm245_vm3, %v246_v4  ;;  %v20_v5 = vld [vmem:[%s305_s0] sm:$0xff]  ;;  %v110_v7 = vld [vmem:[%s306_s3 + $0x8] sm:$0xff]  ;;  %v111_v9 = vld [vmem:[%s306_s3 + $0x10] sm:$0xf]  ;;  %vm119_vm6 = vcmask 162816   ;;  %vm197_vm7 = vcmask 15360  }
   0x3   :  { %v109_v6 = vld [vmem:[%s306_s3] sm:$0xff] }
   0x4   :  { %235 = vmatpush3.bf16.msk.msra.mxu0 %vm234_vm2, %v233_v3  ;;  %v237_v8 = vpack.c.bf16 %v110_v7, %v109_v6  ;;  %v203_v10 = vld [vmem:[%s307_s2] ss:$0 sm:$0xff] }
   0x5   :  { %v206_v15 = vld [vmem:[%s308_s4] ss:$0 sm:$0xff] }
   0x6   :  { %238 = vmatpush3.bf16.msra.mxu1 %v237_v8 }
   0x7   :  { %221 = vmatmul.mubr.msk.f32.vlgmr.msra.gmra.mrb[0].mxu0 %vm30_vm4, %v20_v5  ;;  %227 = vmatprep.subr.mxu1 %v246_v4 }
   0xa   :  { %228 = vmatpush3.msk.msra.mxu1 %vm123_vm5, %v111_v9 }
  0xda   :  { %v104_v11 = vpop.f32.mrb[0].mxu0 }
  0xdb   :  { %v105_v12 = vadd.f32 %v203_v10, %v104_v11  ;;  %v222_v13 = vpop.f32.mrb[1].mxu0 }
  0xdd   :  { %v108_v14 = vmax.f32 %v105_v12, 0.0 }
  0xdf   :  { %230 = vmatmul.mubr.msk.f32.vlgmr.msra.gmra.mrb[0].mxu1 %vm119_vm6, %v108_v14 }
 0x1b2   :  { %v193_v16 = vpop.f32.mrb[0].mxu1 }
 0x1b3   :  { %v194_v17 = vadd.f32 %v206_v15, %v193_v16  ;;  %v231_v18 = vpop.f32.mrb[1].mxu1 }
 0x1b5   :  { %198 = vst.msk [vmem:[%s309_s5] sm:$0xff] %vm197_vm7, %v194_v17 }

</bundles_post_ra>
